<compile_context>
chip_gen: v6e
topology: v6e:2x2x1
jax: 0.10.0
libtpu: 0.0.40
codegen_flags: <defaults>
</compile_context>

<pallas_src>
import jax
import jax.numpy as jnp
from jax.experimental import pallas as pl
from jax.experimental.pallas import tpu as pltpu


def _mlp_kernel(x_ref, w1_ref, b1_ref, w2_ref, b2_ref, o_ref):
    # Cast activations to the matmul compute dtype in-kernel (no extra HBM pass).
    x = x_ref[...].astype(w1_ref.dtype)
    # fc1: MXU matmul with f32 accumulation; bias + ReLU in f32 (v5e-safe VPU).
    h = jnp.dot(x, w1_ref[...], preferred_element_type=jnp.float32)
    h = jnp.maximum(h + b1_ref[...], 0.0)
    # fc2
    out = jnp.dot(h.astype(w2_ref.dtype), w2_ref[...],
                  preferred_element_type=jnp.float32)
    o_ref[...] = (out + b2_ref[...]).astype(o_ref.dtype)


def _round_up(v, m):
    return (v + m - 1) // m * m


def pseudo_label_generator(x, w1, b1, w2, b2, *, tile_n=None,
                           compute_dtype=jnp.bfloat16,
                           out_dtype=jnp.float32):
    """x: (N, in_features); w1: (in_features, hidden); b1: (1, hidden);
       w2: (hidden, out_features); b2: (1, out_features).
       Computes fc2(relu(fc1(x))) = x @ W1 + b1 -> ReLU -> @ W2 + b2
       (weights stored pre-transposed, matching nn.Linear's y = x W^T + b)."""
    n, in_f = x.shape
    hid = w1.shape[1]
    out_f = w2.shape[1]

    cd_sz = jnp.dtype(compute_dtype).itemsize
    out_sz = jnp.dtype(out_dtype).itemsize
    x_sz = x.dtype.itemsize

    # One-time, VMEM-resident weight/bias footprint.
    w_bytes = (in_f * hid + hid * out_f) * cd_sz + (hid + out_f) * 4
    single_buffer_weights = w_bytes > (1 << 20)   # only force Buffered(1) when big

    # Per-batch-row VMEM bytes: double-buffered x & out tiles + in-kernel f32 h,
    # its compute-dtype copy, and the compute-dtype x copy.
    row_bytes = (2 * in_f * x_sz + 2 * out_f * out_sz
                 + hid * (4 + cd_sz) + in_f * cd_sz)

    # Pick the biggest batch tile that keeps the working set under ~32 MiB
    # (kernel is HBM-streaming-bound; large tiles amortize ~0.35 us/grid-step).
    if tile_n is None:
        tile_n = max(256, min(2048,
                              (32 * 1024 * 1024 - w_bytes)
                              // max(row_bytes, 1) // 256 * 256))

    # Batch: pad only to the 8-row sublane multiple; grid is cdiv over that.
    n_pad = _round_up(n, 8)
    if n_pad >= 16:
        # bf16 vregs pack (16,128): keep the tile a multiple of 16 when possible.
        tile_n = max(16, min(tile_n, n_pad) // 16 * 16)
    else:
        tile_n = 8
    grid = (pl.cdiv(n_pad, tile_n),)

    x_p = jnp.pad(x, ((0, n_pad - n), (0, 0))) if n_pad != n else x
    w1_c = w1.astype(compute_dtype)
    w2_c = w2.astype(compute_dtype)
    b1_c = b1.astype(jnp.float32)
    b2_c = b2.astype(jnp.float32)

    def _resident(shape):
        # Constant index_map => fetched once and kept VMEM-resident. Single-buffer
        # it when large so the weight footprint isn't doubled (matters on v7x).
        if single_buffer_weights:
            return pl.BlockSpec(shape, lambda i: (0, 0),
                                pipeline_mode=pl.Buffered(1))
        return pl.BlockSpec(shape, lambda i: (0, 0))

    # Explicit VMEM accounting with headroom; cap at 48 MiB so the same code is
    # safe on v7x (64 MiB physical).  On v5e/v6e-only deployments with huge
    # weights this cap could be raised toward 96 MiB.
    vmem_needed = (tile_n * row_bytes
                   + (1 if single_buffer_weights else 2) * w_bytes)
    vmem_limit = int(min(max(vmem_needed * 3 // 2 + (4 << 20), 16 << 20),
                         48 << 20))

    out_padded = pl.pallas_call(
        _mlp_kernel,
        out_shape=jax.ShapeDtypeStruct((n_pad, out_f), out_dtype),
        grid=grid,
        in_specs=[
            pl.BlockSpec((tile_n, in_f), lambda i: (i, 0)),   # x streams per tile
            _resident((in_f, hid)),                           # W1
            _resident((1, hid)),                              # b1
            _resident((hid, out_f)),                          # W2
            _resident((1, out_f)),                            # b2
        ],
        out_specs=pl.BlockSpec((tile_n, out_f), lambda i: (i, 0)),
        compiler_params=pltpu.CompilerParams(
            # Batch rows are independent: "parallel" lets megacore shard the axis
            # across TensorCores on v7x (no-op on single-TC v5e/v6e).  If a v7x
            # profile shows one TC idle, switch to pltpu.CORE_PARALLEL.
            dimension_semantics=("parallel",),
            vmem_limit_bytes=vmem_limit,
        ),
    )(x_p, w1_c, b1_c, w2_c, b2_c)

    return out_padded[:n, :]


def _init_linear(key, fan_in, fan_out):
    """Deterministic init mimicking nn.Linear default (uniform +/- 1/sqrt(fan_in)).
    Weight returned pre-transposed to (fan_in, fan_out); bias as (1, fan_out)."""
    kw, kb = jax.random.split(key)
    bound = 1.0 / jnp.sqrt(fan_in)
    w = jax.random.uniform(kw, (fan_in, fan_out), jnp.float32, -bound, bound)
    b = jax.random.uniform(kb, (1, fan_out), jnp.float32, -bound, bound)
    return w, b


if __name__ == "__main__":
    key = jax.random.PRNGKey(0)
    k_x, k_fc1, k_fc2 = jax.random.split(key, 3)

    batch = 8
    in_features = 16
    hidden_dim = 32
    out_features = 8

    x = jax.random.normal(k_x, (batch, in_features), jnp.float32)
    w1, b1 = _init_linear(k_fc1, in_features, hidden_dim)
    w2, b2 = _init_linear(k_fc2, hidden_dim, out_features)

    out = pseudo_label_generator(x, w1, b1, w2, b2)
    out = jax.block_until_ready(out)
    assert out.shape == (batch, out_features)

    # Reference mirroring the kernel's numerics (bf16 matmul operands, f32 acc).
    xb = x.astype(jnp.bfloat16)
    w1b = w1.astype(jnp.bfloat16)
    w2b = w2.astype(jnp.bfloat16)
    h_ref = jnp.maximum(
        jnp.dot(xb, w1b, preferred_element_type=jnp.float32) + b1, 0.0)
    ref = jnp.dot(h_ref.astype(jnp.bfloat16), w2b,
                  preferred_element_type=jnp.float32) + b2
    assert jnp.allclose(out, ref, atol=2e-3, rtol=2e-3)

    # Sanity check against the pure-f32 module semantics (loose, bf16 rounding).
    ref_f32 = jnp.maximum(x @ w1 + b1, 0.0) @ w2 + b2
    assert jnp.allclose(out, ref_f32, atol=5e-2, rtol=5e-2)

    print("KERNEL_OK")
</pallas_src>

<mosaic_0001>
module attributes {stable_mosaic.version = 11 : i64} {
  func.func @_mlp_kernel(%arg0: i32, %arg1: memref<8x16xf32, #tpu.memory_space<vmem>>, %arg2: memref<16x32xbf16, #tpu.memory_space<vmem>>, %arg3: memref<1x32xf32, #tpu.memory_space<vmem>>, %arg4: memref<32x8xbf16, #tpu.memory_space<vmem>>, %arg5: memref<1x8xf32, #tpu.memory_space<vmem>>, %arg6: memref<8x8xf32, #tpu.memory_space<vmem>>) attributes {dimension_semantics = [#tpu.dimension_semantics<parallel>], iteration_bounds = array<i64: 1>, scalar_prefetch = 0 : i64, scratch_operands = 0 : i64, tpu.core_type = #tpu.core_type<tc>, window_params = [{transform_indices = @transform_0, window_bounds = array<i64: 8, 16>}, {pipeline_mode = #tpu.pipeline_mode<synchronous>, transform_indices = @transform_1, window_bounds = array<i64: 16, 32>}, {pipeline_mode = #tpu.pipeline_mode<synchronous>, transform_indices = @transform_2, window_bounds = array<i64: 1, 32>}, {pipeline_mode = #tpu.pipeline_mode<synchronous>, transform_indices = @transform_3, window_bounds = array<i64: 32, 8>}, {pipeline_mode = #tpu.pipeline_mode<synchronous>, transform_indices = @transform_4, window_bounds = array<i64: 1, 8>}, {transform_indices = @transform_5, window_bounds = array<i64: 8, 8>}]} {
    %c0 = arith.constant 0 : index
    %c0_0 = arith.constant 0 : index
    %0 = vector.load %arg1[%c0, %c0_0] : memref<8x16xf32, #tpu.memory_space<vmem>>, vector<8x16xf32>
    %1 = arith.truncf %0 : vector<8x16xf32> to vector<8x16xbf16>
    %c0_1 = arith.constant 0 : index
    %c0_2 = arith.constant 0 : index
    %2 = vector.load %arg2[%c0_1, %c0_2] : memref<16x32xbf16, #tpu.memory_space<vmem>>, vector<16x32xbf16>
    %cst = arith.constant dense<0.000000e+00> : vector<8x32xf32>
    %3 = tpu.matmul %1, %2, %cst {dimension_numbers = #tpu.dot_dimension_numbers<[1], [0], [0], [1], [0, 0, 1, 1], [], []>} : vector<8x16xbf16>, vector<16x32xbf16>, vector<8x32xf32> -> vector<8x32xf32>
    %c0_3 = arith.constant 0 : index
    %c0_4 = arith.constant 0 : index
    %4 = vector.load %arg3[%c0_3, %c0_4] : memref<1x32xf32, #tpu.memory_space<vmem>>, vector<1x32xf32>
    %5 = vector.broadcast %4 : vector<1x32xf32> to vector<8x32xf32>
    %6 = arith.addf %3, %5 : vector<8x32xf32>
    %cst_5 = arith.constant 0.000000e+00 : f32
    %7 = vector.broadcast %cst_5 : f32 to vector<8x32xf32>
    %8 = arith.maximumf %6, %7 : vector<8x32xf32>
    %9 = arith.truncf %8 : vector<8x32xf32> to vector<8x32xbf16>
    %c0_6 = arith.constant 0 : index
    %c0_7 = arith.constant 0 : index
    %10 = vector.load %arg4[%c0_6, %c0_7] : memref<32x8xbf16, #tpu.memory_space<vmem>>, vector<32x8xbf16>
    %cst_8 = arith.constant dense<0.000000e+00> : vector<8x8xf32>
    %11 = tpu.matmul %9, %10, %cst_8 {dimension_numbers = #tpu.dot_dimension_numbers<[1], [0], [0], [1], [0, 0, 1, 1], [], []>} : vector<8x32xbf16>, vector<32x8xbf16>, vector<8x8xf32> -> vector<8x8xf32>
    %c0_9 = arith.constant 0 : index
    %c0_10 = arith.constant 0 : index
    %12 = vector.load %arg5[%c0_9, %c0_10] : memref<1x8xf32, #tpu.memory_space<vmem>>, vector<1x8xf32>
    %13 = vector.broadcast %12 : vector<1x8xf32> to vector<8x8xf32>
    %14 = arith.addf %11, %13 : vector<8x8xf32>
    %c0_11 = arith.constant 0 : index
    %c0_12 = arith.constant 0 : index
    %15 = vector.load %arg6[%c0_11, %c0_12] : memref<8x8xf32, #tpu.memory_space<vmem>>, vector<8x8xf32>
    tpu.vector_store %arg6[%c0_11, %c0_12], %14 {strides = array<i32>} : memref<8x8xf32, #tpu.memory_space<vmem>>, vector<8x8xf32>,
    return
  }
  func.func @transform_0(%arg0: i32) -> (i32, i32) {
    %c0_i32 = arith.constant 0 : i32
    %c0_i32_0 = arith.constant 0 : i32
    return %arg0, %c0_i32 : i32, i32
  }
  func.func @transform_1(%arg0: i32) -> (i32, i32) {
    %c0_i32 = arith.constant 0 : i32
    %c0_i32_0 = arith.constant 0 : i32
    %c0_i32_1 = arith.constant 0 : i32
    return %c0_i32, %c0_i32_0 : i32, i32
  }
  func.func @transform_2(%arg0: i32) -> (i32, i32) {
    %c0_i32 = arith.constant 0 : i32
    %c0_i32_0 = arith.constant 0 : i32
    %c0_i32_1 = arith.constant 0 : i32
    return %c0_i32, %c0_i32_0 : i32, i32
  }
  func.func @transform_3(%arg0: i32) -> (i32, i32) {
    %c0_i32 = arith.constant 0 : i32
    %c0_i32_0 = arith.constant 0 : i32
    %c0_i32_1 = arith.constant 0 : i32
    return %c0_i32, %c0_i32_0 : i32, i32
  }
  func.func @transform_4(%arg0: i32) -> (i32, i32) {
    %c0_i32 = arith.constant 0 : i32
    %c0_i32_0 = arith.constant 0 : i32
    %c0_i32_1 = arith.constant 0 : i32
    return %c0_i32, %c0_i32_0 : i32, i32
  }
  func.func @transform_5(%arg0: i32) -> (i32, i32) {
    %c0_i32 = arith.constant 0 : i32
    %c0_i32_0 = arith.constant 0 : i32
    return %arg0, %c0_i32 : i32, i32
  }
}

</mosaic_0001>

<bundles_post_ra>
// kernel: tpu_custom_call.1
= control target key start
LH: loop header
LB: loop body
LE: loop exit
PB: predicated region body
PF: predicated region fallthrough
CT: control target
= control target key end

     0   :  { %v222_v1 = vmov 0.0   ;;  %vm39_vm0 = vcmask 130048   ;;  %vm223_vm1 = vmmov 0   ;;  %s276_s0 = inlined_call_operand.vmem [shape: f32[8,16], index: 0, kind: input, shape index: {}]   ;;  %s277_s1 = inlined_call_operand.vmem [shape: bf16[16,32], index: 1, kind: input, shape index: {}]   ;;  %s278_s2 = inlined_call_operand.vmem [shape: f32[1,32], index: 2, kind: input, shape index: {}]   ;;  %s279_s3 = inlined_call_operand.vmem [shape: bf16[32,8], index: 3, kind: input, shape index: {}]   ;;  %s280_s4 = inlined_call_operand.vmem [shape: f32[1,8], index: 4, kind: input, shape index: {}]   ;;  %s281_s5 = inlined_call_operand.hbm [shape: f32[8,8], index: 5, kind: output, shape index: {}]  }
   0x1   :  { %v197_v0 = vld [vmem:[%s277_s1] sm:$0xff]   ;;  %180 = vmatprep.subr.bf16.mxu0 %v222_v1  ;;  %186 = vmatprep.subr.bf16.mxu1 %v222_v1 }
   0x2   :  { %v22_v2 = vld [vmem:[%s276_s0] sm:$0xff]  ;;  %181 = vmatpush3.bf16.msra.mxu0 %v197_v0  ;;  %182 = vmatprep.mubr.msk.bf16.mxu0 %vm223_vm1, %v222_v1 }
   0x3   :  { %v23_v3 = vpack.c.bf16 %v22_v2, %v22_v2  ;;  %190 = vmatprep.mubr.msk.bf16.mxu1 %vm223_vm1, %v222_v1 }
   0x4   :  { %10 = vsyncpa [#allocation3], 0  ;;  %v198_v4 = vld [vmem:[%s279_s3 + $0x8] sm:$0xff]   ;;  %v199_v5 = vld [vmem:[%s279_s3] sm:$0xff]   ;;  %vm108_vm2 = vcmask 261120   ;;  %s224_s28 = smov [#allocation2]  }
   0x5   :  { %183 = vmatmul.mubr.msk.bf16.vlgmr.msra.gmra.mxu0 %vm39_vm0, %v23_v3  ;;  %187 = vmatpush3.bf16.msra.mxu1 %v198_v4  ;;  %v168_v6 = vld [vmem:[%s278_s2] ss:$0 sm:$0xff]  ;;  %s160_s3 = sshll.u32 %s224_s28, 4  ;;  %vm152_vm3 = vcmask 64512   ;;  %s161_s3 = int_to_ptr.vmem [resolvable:$true] %s160_s3 }
   0x6   :  { %188 = vmatprep.subr.bf16.mxu1 %v222_v1  ;;  %v171_v14 = vld [vmem:[%s280_s4] ss:$0 sm:$0xff]  ;;  %s200_s2 = scalar_lea.vmem %s161_s3, 128  ;;  %p205_p1 = scmp.lt.s32.totalorder %s161_s3, %s161_s3 }
   0x7   :  { %p201_p0 = scmp.ne.s32.totalorder %s161_s3, %s200_s2  ;;  %p206_p2 = scmp.lt.s32.totalorder %s200_s2, %s200_s2 }
   0x9   :  { %189 = vmatpush3.bf16.msra.mxu1 %v199_v5  ;;  %p207_p3 = por %p206_p2, %p205_p1 }
   0xb   :  { %p208_p4 = pnand %p207_p3, %p201_p0 }
  0xc5   :  { %v77_v7 = vpop.f32.mrf.mxu0 }
  0xc6   :  { %v78_v8 = vadd.f32 %v168_v6, %v77_v7 }
  0xc7   :  { %v184_v9 = vpop.f32.mrf.mxu0 }
  0xc8   :  { %v83_v10 = vmax.f32 %v78_v8, 0.0 }
  0xc9   :  { %v80_v11 = vpop.f32.mrf.mxu0 }
  0xca   :  { %v84_v12 = vpack.c.bf16 %v83_v10, %v83_v10 }
  0xcb   :  { %v185_v13 = vpop.f32.mrf.mxu0 }
  0xcc   :  { %191 = vmatmul.mubr.msk.bf16.vlgmr.msra.gmra.mxu1 %vm108_vm2, %v84_v12 }
 0x18c   :  { %v146_v15 = vpop.f32.mrf.mxu1 }
 0x18d   :  { %v147_v16 = vadd.f32 %v171_v14, %v146_v15 }
 0x18e   :  { %v192_v17 = vpop.f32.mrf.mxu1 }
 0x18f   :  { %153 = vst.msk [vmem:[#allocation2] sm:$0xff] %vm152_vm3, %v147_v16 }
 0x190   :  { %v149_v18 = vpop.f32.mrf.mxu1 }
 0x191   :  { %211 = shalt.err (!%p208_p4)
}
 0x192   :  { %163 = dma.vmem_to_hbm [thread:$0]  %s161_s3, 128, %s281_s5, [#allocation3]   ;;  %v193_v19 = vpop.f32.mrf.mxu1 }
 0x193   :  { %220 = dma.done.wait [#allocation3], 128  }
 0x194   :  { %221 = vsyncadd [#allocation3], 4294967168 }
 0x195   :  { %167 = vsyncpa [#allocation3], 1 }

</bundles_post_ra>
